<compile_context>
chip_gen: v6e
topology: v6e:2x2x1
jax: 0.10.0
libtpu: 0.0.40
codegen_flags: <defaults>
</compile_context>

<pallas_src>
import functools

import jax
import jax.numpy as jnp
from jax import lax
from jax.experimental import pallas as pl
from jax.experimental.pallas import tpu as pltpu


def _triplet_all_kernel(x_ref, lab_row_ref, lab_col_ref,
                        sum_ref, cnt_ref, vneg_vmem,
                        *, margin, batch, anchor_block, unroll):
    B = batch
    x = x_ref[...].astype(jnp.float32)                          # (B, D)

    # --- L2 row-normalize (rsqrt -> EUP slot; module's normalize() has no eps) ---
    e = x * lax.rsqrt(jnp.sum(x * x, axis=1, keepdims=True))    # (B, D)

    # --- pairwise euclidean distances ---
    # rows are unit-norm so diag(e @ e.T) == 1 and ||ei - ej||^2 == 2 - 2<ei, ej>
    dot = lax.dot_general(e, e, (((1,), (1,)), ((), ())),
                          preferred_element_type=jnp.float32)   # (B, B)
    dist_sq = jnp.maximum(2.0 - 2.0 * dot, 0.0)
    zero_mask = (dist_sq == 0.0).astype(jnp.float32)
    dist = (1.0 - zero_mask) * jnp.sqrt(dist_sq + zero_mask * 1e-16)

    lab_row = lab_row_ref[...]                                  # (1, B) int32
    lab_col = lab_col_ref[...]                                  # (B, 1) int32
    lab_eq = lab_col == lab_row                                 # (B, B)
    row_ids = lax.broadcasted_iota(jnp.int32, (B, B), 0)
    col_ids = lax.broadcasted_iota(jnp.int32, (B, B), 1)
    not_diag = row_ids != col_ids

    NEG = jnp.float32(-1e9)
    BIG = jnp.float32(1e9)
    margin_f = jnp.float32(margin)

    # All masking + margin folded into two loop-invariant (B, B) matrices.
    # W is symmetric, so its column a (extracted per anchor with a one-hot matvec
    # on the otherwise idle MXU) is the pre-masked, margin-added positive vector.
    w_pos = jnp.where(lab_eq & not_diag, dist + margin_f, NEG)  # (B, B)
    vneg_vmem[...] = jnp.where(lab_eq, BIG, dist)               # (B, B) in VMEM

    p_iota_col = lax.broadcasted_iota(jnp.int32, (B, 1), 0)     # (B, 1)
    a0 = pl.program_id(0) * anchor_block

    def body(j, carry):
        acc_sum, acc_cnt = carry                                # (1, B) accumulators
        a = a0 + j
        onehot_a = (p_iota_col == a).astype(jnp.float32)        # (B, 1)
        # u[p] = W[p, a]: masked (positive, anchor) distances + margin, (B, 1).
        u = lax.dot_general(w_pos, onehot_a, (((1,), (0,)), ((), ())),
                            preferred_element_type=jnp.float32)  # (B, 1)
        v = vneg_vmem[pl.ds(a, 1), :]                           # (1, B): masked d[a, n]
        tl = jnp.maximum(u - v, 0.0)                            # (B, B)
        acc_sum = acc_sum + jnp.sum(tl, axis=0, keepdims=True)  # XLU reduce
        hits = jnp.where(tl > 1e-16, 1.0, 0.0)
        acc_cnt = acc_cnt + jnp.sum(hits, axis=0, keepdims=True)
        return acc_sum, acc_cnt

    zeros = jnp.zeros((1, B), jnp.float32)
    acc_sum, acc_cnt = lax.fori_loop(0, anchor_block, body, (zeros, zeros),
                                     unroll=unroll)

    sum_ref[...] = jnp.sum(acc_sum, keepdims=True).reshape(sum_ref.shape)
    cnt_ref[...] = jnp.sum(acc_cnt, keepdims=True).reshape(cnt_ref.shape)


def _default_num_anchor_blocks(B):
    """1 block on single-TC chips (v5e/v6e) or small batches; 2 only on v7x."""
    if B < 128 or B % 2 != 0:
        return 1
    try:
        kind = jax.devices()[0].device_kind.lower()
    except Exception:
        return 1
    return 2 if ("v7" in kind or "7x" in kind) else 1


def _vmem_limit_bytes(B, D, x_dtype):
    """Only raise the scoped VMEM limit when the (B,B) working set needs it."""
    itemsize = jnp.dtype(x_dtype).itemsize
    est = 6 * B * B * 4 + 2 * B * D * itemsize + (1 << 20)
    if est <= 24 * 1024 * 1024:
        return None                      # default scoped limit is plenty
    # Leave headroom but stay under v7x's 64 MiB physical VMEM per TensorCore.
    return int(min(max(2 * est, 32 * 1024 * 1024), 60 * 1024 * 1024))


def triplet_loss_all(x, labels, margin=0.9, num_anchor_blocks=None):
    """Equivalent of TripletLoss(triplet_type='all', margin=margin)(x, y)."""
    B, D = x.shape
    labels_i32 = labels.reshape(-1).astype(jnp.int32)           # (B,)
    lab_row = labels_i32.reshape(1, B)
    lab_col = labels_i32.reshape(B, 1)

    if num_anchor_blocks is None:
        num_anchor_blocks = _default_num_anchor_blocks(B)
    assert B % num_anchor_blocks == 0
    anchor_block = B // num_anchor_blocks
    # Full unroll only for small batches; deep unroll at large B explodes live ranges.
    unroll = True if (B <= 64 and anchor_block <= 64) else 4

    kern = functools.partial(_triplet_all_kernel, margin=float(margin), batch=B,
                             anchor_block=anchor_block, unroll=unroll)

    sums, cnts = pl.pallas_call(
        kern,
        out_shape=(jax.ShapeDtypeStruct((num_anchor_blocks, 1, 1), jnp.float32),
                   jax.ShapeDtypeStruct((num_anchor_blocks, 1, 1), jnp.float32)),
        grid_spec=pltpu.PrefetchScalarGridSpec(
            num_scalar_prefetch=0,
            grid=(num_anchor_blocks,),
            in_specs=[
                pl.BlockSpec((B, D), lambda i: (0, 0)),         # x stays resident
                pl.BlockSpec((1, B), lambda i: (0, 0)),
                pl.BlockSpec((B, 1), lambda i: (0, 0)),
            ],
            out_specs=[
                pl.BlockSpec((1, 1, 1), lambda i: (i, 0, 0)),
                pl.BlockSpec((1, 1, 1), lambda i: (i, 0, 0)),
            ],
            scratch_shapes=[pltpu.VMEM((B, B), jnp.float32)],
        ),
        compiler_params=pltpu.CompilerParams(
            dimension_semantics=("parallel",),
            vmem_limit_bytes=_vmem_limit_bytes(B, D, x.dtype)),
    )(x, lab_row, lab_col)                                      # x in native dtype

    total = jnp.sum(sums)
    count = jnp.sum(cnts)
    return total / (count + 1e-16)


def _reference_loss(x, labels, margin):
    """Pure-JAX transcription of batch_all_triplet_loss(normalize(x), ...)."""
    norm = jnp.sqrt(jnp.sum(x * x, axis=1, keepdims=True))
    e = x / norm
    dot = e @ e.T
    sq = jnp.diag(dot)
    d = sq[None, :] - 2.0 * dot + sq[:, None]
    d = jnp.maximum(d, 0.0)
    zm = (d == 0.0).astype(jnp.float32)
    d = (1.0 - zm) * jnp.sqrt(d + zm * 1e-16)
    tl = d[:, :, None] - d[:, None, :] + margin
    B = labels.shape[0]
    ind_ne = ~jnp.eye(B, dtype=bool)
    distinct = ind_ne[:, :, None] & ind_ne[:, None, :] & ind_ne[None, :, :]
    leq = labels[None, :] == labels[:, None]
    valid = (~leq[:, None, :]) & leq[:, :, None]
    mask = (valid & distinct).astype(jnp.float32)
    tl = jnp.maximum(mask * tl, 0.0)
    num_pos = jnp.sum((tl > 1e-16).astype(jnp.float32))
    return jnp.sum(tl) / (num_pos + 1e-16)


if __name__ == "__main__":
    key = jax.random.PRNGKey(0)
    kx, kl = jax.random.split(key)
    B, D = 8, 32
    x = jax.random.normal(kx, (B, D), dtype=jnp.float32)        # embeddings
    y = jax.random.randint(kl, (B, 1), 0, 3, dtype=jnp.int32)   # meta classes (y.view(-1) in torch)
    margin = 0.9

    loss = triplet_loss_all(x, y.reshape(-1), margin)
    loss = jax.block_until_ready(loss)

    ref = _reference_loss(x, y.reshape(-1).astype(jnp.int32), margin)
    assert jnp.allclose(loss, ref, atol=1e-5, rtol=1e-5), (float(loss), float(ref))

    print("KERNEL_OK")
</pallas_src>

<mosaic_0001>
module attributes {stable_mosaic.version = 11 : i64} {
  func.func @_triplet_all_kernel(%arg0: i32, %arg1: memref<8x32xf32, #tpu.memory_space<vmem>>, %arg2: memref<1x8xi32, #tpu.memory_space<vmem>>, %arg3: memref<8x1xi32, #tpu.memory_space<vmem>>, %arg4: memref<1x1x1xf32, #tpu.memory_space<vmem>>, %arg5: memref<1x1x1xf32, #tpu.memory_space<vmem>>, %arg6: memref<8x8xf32, #tpu.memory_space<vmem>>) attributes {dimension_semantics = [#tpu.dimension_semantics<parallel>], iteration_bounds = array<i64: 1>, scalar_prefetch = 0 : i64, scratch_operands = 1 : i64, tpu.core_type = #tpu.core_type<tc>, window_params = [{pipeline_mode = #tpu.pipeline_mode<synchronous>, transform_indices = @transform_0, window_bounds = array<i64: 8, 32>}, {pipeline_mode = #tpu.pipeline_mode<synchronous>, transform_indices = @transform_1, window_bounds = array<i64: 1, 8>}, {pipeline_mode = #tpu.pipeline_mode<synchronous>, transform_indices = @transform_2, window_bounds = array<i64: 8, 1>}, {transform_indices = @transform_3, window_bounds = array<i64: 1, 1, 1>}, {transform_indices = @transform_4, window_bounds = array<i64: 1, 1, 1>}]} {
    %c0 = arith.constant 0 : index
    %c0_0 = arith.constant 0 : index
    %0 = vector.load %arg1[%c0, %c0_0] : memref<8x32xf32, #tpu.memory_space<vmem>>, vector<8x32xf32>
    %1 = arith.mulf %0, %0 : vector<8x32xf32>
    %cst = arith.constant dense<0.000000e+00> : vector<8xf32>
    %2 = vector.multi_reduction <add>, %1, %cst [1] : vector<8x32xf32> to vector<8xf32>
    %3 = vector.shape_cast %2 : vector<8xf32> to vector<8x1xf32>
    %4 = math.rsqrt %3 : vector<8x1xf32>
    %5 = vector.broadcast %4 : vector<8x1xf32> to vector<8x32xf32>
    %6 = arith.mulf %0, %5 : vector<8x32xf32>
    %cst_1 = arith.constant dense<0.000000e+00> : vector<8x8xf32>
    %7 = tpu.matmul %6, %6, %cst_1 {dimension_numbers = #tpu.dot_dimension_numbers<[1], [1], [0], [0], [0, 0, 1, 0], [], []>} : vector<8x32xf32>, vector<8x32xf32>, vector<8x8xf32> -> vector<8x8xf32>
    %cst_2 = arith.constant 2.000000e+00 : f32
    %8 = vector.broadcast %cst_2 : f32 to vector<8x8xf32>
    %9 = arith.mulf %8, %7 : vector<8x8xf32>
    %cst_3 = arith.constant 2.000000e+00 : f32
    %10 = vector.broadcast %cst_3 : f32 to vector<8x8xf32>
    %11 = arith.subf %10, %9 : vector<8x8xf32>
    %cst_4 = arith.constant 0.000000e+00 : f32
    %12 = vector.broadcast %cst_4 : f32 to vector<8x8xf32>
    %13 = arith.maximumf %11, %12 : vector<8x8xf32>
    %cst_5 = arith.constant 0.000000e+00 : f32
    %14 = vector.broadcast %cst_5 : f32 to vector<8x8xf32>
    %15 = arith.cmpf oeq, %13, %14 : vector<8x8xf32>
    %16 = arith.extui %15 : vector<8x8xi1> to vector<8x8xi32>
    %17 = arith.sitofp %16 : vector<8x8xi32> to vector<8x8xf32>
    %cst_6 = arith.constant 1.000000e+00 : f32
    %18 = vector.broadcast %cst_6 : f32 to vector<8x8xf32>
    %19 = arith.subf %18, %17 : vector<8x8xf32>
    %cst_7 = arith.constant 1.000000e-16 : f32
    %20 = vector.broadcast %cst_7 : f32 to vector<8x8xf32>
    %21 = arith.mulf %17, %20 : vector<8x8xf32>
    %22 = arith.addf %13, %21 : vector<8x8xf32>
    %23 = math.sqrt %22 : vector<8x8xf32>
    %24 = arith.mulf %19, %23 : vector<8x8xf32>
    %c0_8 = arith.constant 0 : index
    %c0_9 = arith.constant 0 : index
    %25 = vector.load %arg2[%c0_8, %c0_9] : memref<1x8xi32, #tpu.memory_space<vmem>>, vector<1x8xi32>
    %c0_10 = arith.constant 0 : index
    %c0_11 = arith.constant 0 : index
    %26 = vector.load %arg3[%c0_10, %c0_11] : memref<8x1xi32, #tpu.memory_space<vmem>>, vector<8x1xi32>
    %27 = vector.broadcast %26 : vector<8x1xi32> to vector<8x8xi32>
    %28 = vector.broadcast %25 : vector<1x8xi32> to vector<8x8xi32>
    %29 = arith.cmpi eq, %27, %28 : vector<8x8xi32>
    %30 = tpu.iota {dimensions = array<i32: 0>} : vector<8x8xi32>
    %31 = tpu.iota {dimensions = array<i32: 1>} : vector<8x8xi32>
    %32 = arith.cmpi ne, %30, %31 : vector<8x8xi32>
    %33 = arith.andi %29, %32 : vector<8x8xi1>
    %cst_12 = arith.constant 0.899999976 : f32
    %34 = vector.broadcast %cst_12 : f32 to vector<8x8xf32>
    %35 = arith.addf %24, %34 : vector<8x8xf32>
    %cst_13 = arith.constant -1.000000e+09 : f32
    %36 = vector.broadcast %cst_13 : f32 to vector<8x8xf32>
    %37 = arith.select %33, %35, %36 : vector<8x8xi1>, vector<8x8xf32>
    %cst_14 = arith.constant 1.000000e+09 : f32
    %38 = vector.broadcast %cst_14 : f32 to vector<8x8xf32>
    %39 = arith.select %29, %38, %24 : vector<8x8xi1>, vector<8x8xf32>
    %c0_15 = arith.constant 0 : index
    %c0_16 = arith.constant 0 : index
    %40 = vector.load %arg6[%c0_15, %c0_16] : memref<8x8xf32, #tpu.memory_space<vmem>>, vector<8x8xf32>
    tpu.vector_store %arg6[%c0_15, %c0_16], %39 {strides = array<i32>} : memref<8x8xf32, #tpu.memory_space<vmem>>, vector<8x8xf32>,
    %41 = tpu.iota {dimensions = array<i32: 0>} : vector<8x1xi32>
    %c8_i32 = arith.constant 8 : i32
    %42 = arith.muli %arg0, %c8_i32 : i32
    %cst_17 = arith.constant 0.000000e+00 : f32
    %43 = vector.broadcast %cst_17 : f32 to vector<1x8xf32>
    %c0_i32 = arith.constant 0 : i32
    %44 = arith.addi %42, %c0_i32 : i32
    %45 = vector.broadcast %44 : i32 to vector<8x1xi32>
    %46 = arith.cmpi eq, %41, %45 : vector<8x1xi32>
    %47 = arith.extui %46 : vector<8x1xi1> to vector<8x1xi32>
    %48 = arith.sitofp %47 : vector<8x1xi32> to vector<8x1xf32>
    %cst_18 = arith.constant dense<0.000000e+00> : vector<8x1xf32>
    %49 = tpu.matmul %37, %48, %cst_18 {dimension_numbers = #tpu.dot_dimension_numbers<[1], [0], [0], [1], [0, 0, 1, 1], [], []>} : vector<8x8xf32>, vector<8x1xf32>, vector<8x1xf32> -> vector<8x1xf32>
    %50 = arith.index_cast %44 : i32 to index
    %c0_19 = arith.constant 0 : index
    %51 = vector.load %arg6[%50, %c0_19] : memref<8x8xf32, #tpu.memory_space<vmem>>, vector<1x8xf32>
    %52 = vector.broadcast %49 : vector<8x1xf32> to vector<8x8xf32>
    %53 = vector.broadcast %51 : vector<1x8xf32> to vector<8x8xf32>
    %54 = arith.subf %52, %53 : vector<8x8xf32>
    %cst_20 = arith.constant 0.000000e+00 : f32
    %55 = vector.broadcast %cst_20 : f32 to vector<8x8xf32>
    %56 = arith.maximumf %54, %55 : vector<8x8xf32>
    %cst_21 = arith.constant dense<0.000000e+00> : vector<8xf32>
    %57 = vector.multi_reduction <add>, %56, %cst_21 [0] : vector<8x8xf32> to vector<8xf32>
    %58 = vector.shape_cast %57 : vector<8xf32> to vector<1x8xf32>
    %59 = arith.addf %43, %58 : vector<1x8xf32>
    %cst_22 = arith.constant 1.000000e-16 : f32
    %60 = vector.broadcast %cst_22 : f32 to vector<8x8xf32>
    %61 = arith.cmpf ogt, %56, %60 : vector<8x8xf32>
    %cst_23 = arith.constant 1.000000e+00 : f32
    %cst_24 = arith.constant 0.000000e+00 : f32
    %62 = vector.broadcast %cst_23 : f32 to vector<8x8xf32>
    %63 = vector.broadcast %cst_24 : f32 to vector<8x8xf32>
    %64 = arith.select %61, %62, %63 : vector<8x8xi1>, vector<8x8xf32>
    %cst_25 = arith.constant dense<0.000000e+00> : vector<8xf32>
    %65 = vector.multi_reduction <add>, %64, %cst_25 [0] : vector<8x8xf32> to vector<8xf32>
    %66 = vector.shape_cast %65 : vector<8xf32> to vector<1x8xf32>
    %67 = arith.addf %43, %66 : vector<1x8xf32>
    %c1_i32 = arith.constant 1 : i32
    %68 = arith.addi %42, %c1_i32 : i32
    %69 = vector.broadcast %68 : i32 to vector<8x1xi32>
    %70 = arith.cmpi eq, %41, %69 : vector<8x1xi32>
    %71 = arith.extui %70 : vector<8x1xi1> to vector<8x1xi32>
    %72 = arith.sitofp %71 : vector<8x1xi32> to vector<8x1xf32>
    %cst_26 = arith.constant dense<0.000000e+00> : vector<8x1xf32>
    %73 = tpu.matmul %37, %72, %cst_26 {dimension_numbers = #tpu.dot_dimension_numbers<[1], [0], [0], [1], [0, 0, 1, 1], [], []>} : vector<8x8xf32>, vector<8x1xf32>, vector<8x1xf32> -> vector<8x1xf32>
    %74 = arith.index_cast %68 : i32 to index
    %c0_27 = arith.constant 0 : index
    %75 = vector.load %arg6[%74, %c0_27] : memref<8x8xf32, #tpu.memory_space<vmem>>, vector<1x8xf32>
    %76 = vector.broadcast %73 : vector<8x1xf32> to vector<8x8xf32>
    %77 = vector.broadcast %75 : vector<1x8xf32> to vector<8x8xf32>
    %78 = arith.subf %76, %77 : vector<8x8xf32>
    %cst_28 = arith.constant 0.000000e+00 : f32
    %79 = vector.broadcast %cst_28 : f32 to vector<8x8xf32>
    %80 = arith.maximumf %78, %79 : vector<8x8xf32>
    %cst_29 = arith.constant dense<0.000000e+00> : vector<8xf32>
    %81 = vector.multi_reduction <add>, %80, %cst_29 [0] : vector<8x8xf32> to vector<8xf32>
    %82 = vector.shape_cast %81 : vector<8xf32> to vector<1x8xf32>
    %83 = arith.addf %59, %82 : vector<1x8xf32>
    %cst_30 = arith.constant 1.000000e-16 : f32
    %84 = vector.broadcast %cst_30 : f32 to vector<8x8xf32>
    %85 = arith.cmpf ogt, %80, %84 : vector<8x8xf32>
    %cst_31 = arith.constant 1.000000e+00 : f32
    %cst_32 = arith.constant 0.000000e+00 : f32
    %86 = vector.broadcast %cst_31 : f32 to vector<8x8xf32>
    %87 = vector.broadcast %cst_32 : f32 to vector<8x8xf32>
    %88 = arith.select %85, %86, %87 : vector<8x8xi1>, vector<8x8xf32>
    %cst_33 = arith.constant dense<0.000000e+00> : vector<8xf32>
    %89 = vector.multi_reduction <add>, %88, %cst_33 [0] : vector<8x8xf32> to vector<8xf32>
    %90 = vector.shape_cast %89 : vector<8xf32> to vector<1x8xf32>
    %91 = arith.addf %67, %90 : vector<1x8xf32>
    %c2_i32 = arith.constant 2 : i32
    %92 = arith.addi %42, %c2_i32 : i32
    %93 = vector.broadcast %92 : i32 to vector<8x1xi32>
    %94 = arith.cmpi eq, %41, %93 : vector<8x1xi32>
    %95 = arith.extui %94 : vector<8x1xi1> to vector<8x1xi32>
    %96 = arith.sitofp %95 : vector<8x1xi32> to vector<8x1xf32>
    %cst_34 = arith.constant dense<0.000000e+00> : vector<8x1xf32>
    %97 = tpu.matmul %37, %96, %cst_34 {dimension_numbers = #tpu.dot_dimension_numbers<[1], [0], [0], [1], [0, 0, 1, 1], [], []>} : vector<8x8xf32>, vector<8x1xf32>, vector<8x1xf32> -> vector<8x1xf32>
    %98 = arith.index_cast %92 : i32 to index
    %c0_35 = arith.constant 0 : index
    %99 = vector.load %arg6[%98, %c0_35] : memref<8x8xf32, #tpu.memory_space<vmem>>, vector<1x8xf32>
    %100 = vector.broadcast %97 : vector<8x1xf32> to vector<8x8xf32>
    %101 = vector.broadcast %99 : vector<1x8xf32> to vector<8x8xf32>
    %102 = arith.subf %100, %101 : vector<8x8xf32>
    %cst_36 = arith.constant 0.000000e+00 : f32
    %103 = vector.broadcast %cst_36 : f32 to vector<8x8xf32>
    %104 = arith.maximumf %102, %103 : vector<8x8xf32>
    %cst_37 = arith.constant dense<0.000000e+00> : vector<8xf32>
    %105 = vector.multi_reduction <add>, %104, %cst_37 [0] : vector<8x8xf32> to vector<8xf32>
    %106 = vector.shape_cast %105 : vector<8xf32> to vector<1x8xf32>
    %107 = arith.addf %83, %106 : vector<1x8xf32>
    %cst_38 = arith.constant 1.000000e-16 : f32
    %108 = vector.broadcast %cst_38 : f32 to vector<8x8xf32>
    %109 = arith.cmpf ogt, %104, %108 : vector<8x8xf32>
    %cst_39 = arith.constant 1.000000e+00 : f32
    %cst_40 = arith.constant 0.000000e+00 : f32
    %110 = vector.broadcast %cst_39 : f32 to vector<8x8xf32>
    %111 = vector.broadcast %cst_40 : f32 to vector<8x8xf32>
    %112 = arith.select %109, %110, %111 : vector<8x8xi1>, vector<8x8xf32>
    %cst_41 = arith.constant dense<0.000000e+00> : vector<8xf32>
    %113 = vector.multi_reduction <add>, %112, %cst_41 [0] : vector<8x8xf32> to vector<8xf32>
    %114 = vector.shape_cast %113 : vector<8xf32> to vector<1x8xf32>
    %115 = arith.addf %91, %114 : vector<1x8xf32>
    %c3_i32 = arith.constant 3 : i32
    %116 = arith.addi %42, %c3_i32 : i32
    %117 = vector.broadcast %116 : i32 to vector<8x1xi32>
    %118 = arith.cmpi eq, %41, %117 : vector<8x1xi32>
    %119 = arith.extui %118 : vector<8x1xi1> to vector<8x1xi32>
    %120 = arith.sitofp %119 : vector<8x1xi32> to vector<8x1xf32>
    %cst_42 = arith.constant dense<0.000000e+00> : vector<8x1xf32>
    %121 = tpu.matmul %37, %120, %cst_42 {dimension_numbers = #tpu.dot_dimension_numbers<[1], [0], [0], [1], [0, 0, 1, 1], [], []>} : vector<8x8xf32>, vector<8x1xf32>, vector<8x1xf32> -> vector<8x1xf32>
    %122 = arith.index_cast %116 : i32 to index
    %c0_43 = arith.constant 0 : index
    %123 = vector.load %arg6[%122, %c0_43] : memref<8x8xf32, #tpu.memory_space<vmem>>, vector<1x8xf32>
    %124 = vector.broadcast %121 : vector<8x1xf32> to vector<8x8xf32>
    %125 = vector.broadcast %123 : vector<1x8xf32> to vector<8x8xf32>
    %126 = arith.subf %124, %125 : vector<8x8xf32>
    %cst_44 = arith.constant 0.000000e+00 : f32
    %127 = vector.broadcast %cst_44 : f32 to vector<8x8xf32>
    %128 = arith.maximumf %126, %127 : vector<8x8xf32>
    %cst_45 = arith.constant dense<0.000000e+00> : vector<8xf32>
    %129 = vector.multi_reduction <add>, %128, %cst_45 [0] : vector<8x8xf32> to vector<8xf32>
    %130 = vector.shape_cast %129 : vector<8xf32> to vector<1x8xf32>
    %131 = arith.addf %107, %130 : vector<1x8xf32>
    %cst_46 = arith.constant 1.000000e-16 : f32
    %132 = vector.broadcast %cst_46 : f32 to vector<8x8xf32>
    %133 = arith.cmpf ogt, %128, %132 : vector<8x8xf32>
    %cst_47 = arith.constant 1.000000e+00 : f32
    %cst_48 = arith.constant 0.000000e+00 : f32
    %134 = vector.broadcast %cst_47 : f32 to vector<8x8xf32>
    %135 = vector.broadcast %cst_48 : f32 to vector<8x8xf32>
    %136 = arith.select %133, %134, %135 : vector<8x8xi1>, vector<8x8xf32>
    %cst_49 = arith.constant dense<0.000000e+00> : vector<8xf32>
    %137 = vector.multi_reduction <add>, %136, %cst_49 [0] : vector<8x8xf32> to vector<8xf32>
    %138 = vector.shape_cast %137 : vector<8xf32> to vector<1x8xf32>
    %139 = arith.addf %115, %138 : vector<1x8xf32>
    %c4_i32 = arith.constant 4 : i32
    %140 = arith.addi %42, %c4_i32 : i32
    %141 = vector.broadcast %140 : i32 to vector<8x1xi32>
    %142 = arith.cmpi eq, %41, %141 : vector<8x1xi32>
    %143 = arith.extui %142 : vector<8x1xi1> to vector<8x1xi32>
    %144 = arith.sitofp %143 : vector<8x1xi32> to vector<8x1xf32>
    %cst_50 = arith.constant dense<0.000000e+00> : vector<8x1xf32>
    %145 = tpu.matmul %37, %144, %cst_50 {dimension_numbers = #tpu.dot_dimension_numbers<[1], [0], [0], [1], [0, 0, 1, 1], [], []>} : vector<8x8xf32>, vector<8x1xf32>, vector<8x1xf32> -> vector<8x1xf32>
    %146 = arith.index_cast %140 : i32 to index
    %c0_51 = arith.constant 0 : index
    %147 = vector.load %arg6[%146, %c0_51] : memref<8x8xf32, #tpu.memory_space<vmem>>, vector<1x8xf32>
    %148 = vector.broadcast %145 : vector<8x1xf32> to vector<8x8xf32>
    %149 = vector.broadcast %147 : vector<1x8xf32> to vector<8x8xf32>
    %150 = arith.subf %148, %149 : vector<8x8xf32>
    %cst_52 = arith.constant 0.000000e+00 : f32
    %151 = vector.broadcast %cst_52 : f32 to vector<8x8xf32>
    %152 = arith.maximumf %150, %151 : vector<8x8xf32>
    %cst_53 = arith.constant dense<0.000000e+00> : vector<8xf32>
    %153 = vector.multi_reduction <add>, %152, %cst_53 [0] : vector<8x8xf32> to vector<8xf32>
    %154 = vector.shape_cast %153 : vector<8xf32> to vector<1x8xf32>
    %155 = arith.addf %131, %154 : vector<1x8xf32>
    %cst_54 = arith.constant 1.000000e-16 : f32
    %156 = vector.broadcast %cst_54 : f32 to vector<8x8xf32>
    %157 = arith.cmpf ogt, %152, %156 : vector<8x8xf32>
    %cst_55 = arith.constant 1.000000e+00 : f32
    %cst_56 = arith.constant 0.000000e+00 : f32
    %158 = vector.broadcast %cst_55 : f32 to vector<8x8xf32>
    %159 = vector.broadcast %cst_56 : f32 to vector<8x8xf32>
    %160 = arith.select %157, %158, %159 : vector<8x8xi1>, vector<8x8xf32>
    %cst_57 = arith.constant dense<0.000000e+00> : vector<8xf32>
    %161 = vector.multi_reduction <add>, %160, %cst_57 [0] : vector<8x8xf32> to vector<8xf32>
    %162 = vector.shape_cast %161 : vector<8xf32> to vector<1x8xf32>
    %163 = arith.addf %139, %162 : vector<1x8xf32>
    %c5_i32 = arith.constant 5 : i32
    %164 = arith.addi %42, %c5_i32 : i32
    %165 = vector.broadcast %164 : i32 to vector<8x1xi32>
    %166 = arith.cmpi eq, %41, %165 : vector<8x1xi32>
    %167 = arith.extui %166 : vector<8x1xi1> to vector<8x1xi32>
    %168 = arith.sitofp %167 : vector<8x1xi32> to vector<8x1xf32>
    %cst_58 = arith.constant dense<0.000000e+00> : vector<8x1xf32>
    %169 = tpu.matmul %37, %168, %cst_58 {dimension_numbers = #tpu.dot_dimension_numbers<[1], [0], [0], [1], [0, 0, 1, 1], [], []>} : vector<8x8xf32>, vector<8x1xf32>, vector<8x1xf32> -> vector<8x1xf32>
    %170 = arith.index_cast %164 : i32 to index
    %c0_59 = arith.constant 0 : index
    %171 = vector.load %arg6[%170, %c0_59] : memref<8x8xf32, #tpu.memory_space<vmem>>, vector<1x8xf32>
    %172 = vector.broadcast %169 : vector<8x1xf32> to vector<8x8xf32>
    %173 = vector.broadcast %171 : vector<1x8xf32> to vector<8x8xf32>
    %174 = arith.subf %172, %173 : vector<8x8xf32>
    %cst_60 = arith.constant 0.000000e+00 : f32
    %175 = vector.broadcast %cst_60 : f32 to vector<8x8xf32>
    %176 = arith.maximumf %174, %175 : vector<8x8xf32>
    %cst_61 = arith.constant dense<0.000000e+00> : vector<8xf32>
    %177 = vector.multi_reduction <add>, %176, %cst_61 [0] : vector<8x8xf32> to vector<8xf32>
    %178 = vector.shape_cast %177 : vector<8xf32> to vector<1x8xf32>
    %179 = arith.addf %155, %178 : vector<1x8xf32>
    %cst_62 = arith.constant 1.000000e-16 : f32
    %180 = vector.broadcast %cst_62 : f32 to vector<8x8xf32>
    %181 = arith.cmpf ogt, %176, %180 : vector<8x8xf32>
    %cst_63 = arith.constant 1.000000e+00 : f32
    %cst_64 = arith.constant 0.000000e+00 : f32
    %182 = vector.broadcast %cst_63 : f32 to vector<8x8xf32>
    %183 = vector.broadcast %cst_64 : f32 to vector<8x8xf32>
    %184 = arith.select %181, %182, %183 : vector<8x8xi1>, vector<8x8xf32>
    %cst_65 = arith.constant dense<0.000000e+00> : vector<8xf32>
    %185 = vector.multi_reduction <add>, %184, %cst_65 [0] : vector<8x8xf32> to vector<8xf32>
    %186 = vector.shape_cast %185 : vector<8xf32> to vector<1x8xf32>
    %187 = arith.addf %163, %186 : vector<1x8xf32>
    %c6_i32 = arith.constant 6 : i32
    %188 = arith.addi %42, %c6_i32 : i32
    %189 = vector.broadcast %188 : i32 to vector<8x1xi32>
    %190 = arith.cmpi eq, %41, %189 : vector<8x1xi32>
    %191 = arith.extui %190 : vector<8x1xi1> to vector<8x1xi32>
    %192 = arith.sitofp %191 : vector<8x1xi32> to vector<8x1xf32>
    %cst_66 = arith.constant dense<0.000000e+00> : vector<8x1xf32>
    %193 = tpu.matmul %37, %192, %cst_66 {dimension_numbers = #tpu.dot_dimension_numbers<[1], [0], [0], [1], [0, 0, 1, 1], [], []>} : vector<8x8xf32>, vector<8x1xf32>, vector<8x1xf32> -> vector<8x1xf32>
    %194 = arith.index_cast %188 : i32 to index
    %c0_67 = arith.constant 0 : index
    %195 = vector.load %arg6[%194, %c0_67] : memref<8x8xf32, #tpu.memory_space<vmem>>, vector<1x8xf32>
    %196 = vector.broadcast %193 : vector<8x1xf32> to vector<8x8xf32>
    %197 = vector.broadcast %195 : vector<1x8xf32> to vector<8x8xf32>
    %198 = arith.subf %196, %197 : vector<8x8xf32>
    %cst_68 = arith.constant 0.000000e+00 : f32
    %199 = vector.broadcast %cst_68 : f32 to vector<8x8xf32>
    %200 = arith.maximumf %198, %199 : vector<8x8xf32>
    %cst_69 = arith.constant dense<0.000000e+00> : vector<8xf32>
    %201 = vector.multi_reduction <add>, %200, %cst_69 [0] : vector<8x8xf32> to vector<8xf32>
    %202 = vector.shape_cast %201 : vector<8xf32> to vector<1x8xf32>
    %203 = arith.addf %179, %202 : vector<1x8xf32>
    %cst_70 = arith.constant 1.000000e-16 : f32
    %204 = vector.broadcast %cst_70 : f32 to vector<8x8xf32>
    %205 = arith.cmpf ogt, %200, %204 : vector<8x8xf32>
    %cst_71 = arith.constant 1.000000e+00 : f32
    %cst_72 = arith.constant 0.000000e+00 : f32
    %206 = vector.broadcast %cst_71 : f32 to vector<8x8xf32>
    %207 = vector.broadcast %cst_72 : f32 to vector<8x8xf32>
    %208 = arith.select %205, %206, %207 : vector<8x8xi1>, vector<8x8xf32>
    %cst_73 = arith.constant dense<0.000000e+00> : vector<8xf32>
    %209 = vector.multi_reduction <add>, %208, %cst_73 [0] : vector<8x8xf32> to vector<8xf32>
    %210 = vector.shape_cast %209 : vector<8xf32> to vector<1x8xf32>
    %211 = arith.addf %187, %210 : vector<1x8xf32>
    %c7_i32 = arith.constant 7 : i32
    %212 = arith.addi %42, %c7_i32 : i32
    %213 = vector.broadcast %212 : i32 to vector<8x1xi32>
    %214 = arith.cmpi eq, %41, %213 : vector<8x1xi32>
    %215 = arith.extui %214 : vector<8x1xi1> to vector<8x1xi32>
    %216 = arith.sitofp %215 : vector<8x1xi32> to vector<8x1xf32>
    %cst_74 = arith.constant dense<0.000000e+00> : vector<8x1xf32>
    %217 = tpu.matmul %37, %216, %cst_74 {dimension_numbers = #tpu.dot_dimension_numbers<[1], [0], [0], [1], [0, 0, 1, 1], [], []>} : vector<8x8xf32>, vector<8x1xf32>, vector<8x1xf32> -> vector<8x1xf32>
    %218 = arith.index_cast %212 : i32 to index
    %c0_75 = arith.constant 0 : index
    %219 = vector.load %arg6[%218, %c0_75] : memref<8x8xf32, #tpu.memory_space<vmem>>, vector<1x8xf32>
    %220 = vector.broadcast %217 : vector<8x1xf32> to vector<8x8xf32>
    %221 = vector.broadcast %219 : vector<1x8xf32> to vector<8x8xf32>
    %222 = arith.subf %220, %221 : vector<8x8xf32>
    %cst_76 = arith.constant 0.000000e+00 : f32
    %223 = vector.broadcast %cst_76 : f32 to vector<8x8xf32>
    %224 = arith.maximumf %222, %223 : vector<8x8xf32>
    %cst_77 = arith.constant dense<0.000000e+00> : vector<8xf32>
    %225 = vector.multi_reduction <add>, %224, %cst_77 [0] : vector<8x8xf32> to vector<8xf32>
    %226 = vector.shape_cast %225 : vector<8xf32> to vector<1x8xf32>
    %227 = arith.addf %203, %226 : vector<1x8xf32>
    %cst_78 = arith.constant 1.000000e-16 : f32
    %228 = vector.broadcast %cst_78 : f32 to vector<8x8xf32>
    %229 = arith.cmpf ogt, %224, %228 : vector<8x8xf32>
    %cst_79 = arith.constant 1.000000e+00 : f32
    %cst_80 = arith.constant 0.000000e+00 : f32
    %230 = vector.broadcast %cst_79 : f32 to vector<8x8xf32>
    %231 = vector.broadcast %cst_80 : f32 to vector<8x8xf32>
    %232 = arith.select %229, %230, %231 : vector<8x8xi1>, vector<8x8xf32>
    %cst_81 = arith.constant dense<0.000000e+00> : vector<8xf32>
    %233 = vector.multi_reduction <add>, %232, %cst_81 [0] : vector<8x8xf32> to vector<8xf32>
    %234 = vector.shape_cast %233 : vector<8xf32> to vector<1x8xf32>
    %235 = arith.addf %211, %234 : vector<1x8xf32>
    %c8_i32_82 = arith.constant 8 : i32
    %236 = vector.shape_cast %227 : vector<1x8xf32> to vector<1x1x8xf32>
    %cst_83 = arith.constant dense<0.000000e+00> : vector<1xf32>
    %237 = vector.multi_reduction <add>, %236, %cst_83 [1, 2] : vector<1x1x8xf32> to vector<1xf32>
    %238 = vector.shape_cast %237 : vector<1xf32> to vector<1x1x1xf32>
    %239 = vector.extract %238[0, 0, 0] : f32 from vector<1x1x1xf32>
    %240 = vector.broadcast %239 : f32 to vector<1x1xf32>
    %241 = vector.shape_cast %240 : vector<1x1xf32> to vector<1x1x1xf32>
    %c0_84 = arith.constant 0 : index
    %c0_85 = arith.constant 0 : index
    %c0_86 = arith.constant 0 : index
    %242 = vector.load %arg4[%c0_84, %c0_85, %c0_86] : memref<1x1x1xf32, #tpu.memory_space<vmem>>, vector<1x1x1xf32>
    tpu.vector_store %arg4[%c0_84, %c0_85, %c0_86], %241 {strides = array<i32>} : memref<1x1x1xf32, #tpu.memory_space<vmem>>, vector<1x1x1xf32>,
    %243 = vector.shape_cast %235 : vector<1x8xf32> to vector<1x1x8xf32>
    %cst_87 = arith.constant dense<0.000000e+00> : vector<1xf32>
    %244 = vector.multi_reduction <add>, %243, %cst_87 [1, 2] : vector<1x1x8xf32> to vector<1xf32>
    %245 = vector.shape_cast %244 : vector<1xf32> to vector<1x1x1xf32>
    %246 = vector.extract %245[0, 0, 0] : f32 from vector<1x1x1xf32>
    %247 = vector.broadcast %246 : f32 to vector<1x1xf32>
    %248 = vector.shape_cast %247 : vector<1x1xf32> to vector<1x1x1xf32>
    %c0_88 = arith.constant 0 : index
    %c0_89 = arith.constant 0 : index
    %c0_90 = arith.constant 0 : index
    %249 = vector.load %arg5[%c0_88, %c0_89, %c0_90] : memref<1x1x1xf32, #tpu.memory_space<vmem>>, vector<1x1x1xf32>
    tpu.vector_store %arg5[%c0_88, %c0_89, %c0_90], %248 {strides = array<i32>} : memref<1x1x1xf32, #tpu.memory_space<vmem>>, vector<1x1x1xf32>,
    return
  }
  func.func @transform_0(%arg0: i32) -> (i32, i32) {
    %c0_i32 = arith.constant 0 : i32
    %c0_i32_0 = arith.constant 0 : i32
    %c0_i32_1 = arith.constant 0 : i32
    return %c0_i32, %c0_i32_0 : i32, i32
  }
  func.func @transform_1(%arg0: i32) -> (i32, i32) {
    %c0_i32 = arith.constant 0 : i32
    %c0_i32_0 = arith.constant 0 : i32
    %c0_i32_1 = arith.constant 0 : i32
    return %c0_i32, %c0_i32_0 : i32, i32
  }
  func.func @transform_2(%arg0: i32) -> (i32, i32) {
    %c0_i32 = arith.constant 0 : i32
    %c0_i32_0 = arith.constant 0 : i32
    %c0_i32_1 = arith.constant 0 : i32
    return %c0_i32, %c0_i32_0 : i32, i32
  }
  func.func @transform_3(%arg0: i32) -> (i32, i32, i32) {
    %c0_i32 = arith.constant 0 : i32
    %c0_i32_0 = arith.constant 0 : i32
    %c0_i32_1 = arith.constant 0 : i32
    return %arg0, %c0_i32, %c0_i32_0 : i32, i32, i32
  }
  func.func @transform_4(%arg0: i32) -> (i32, i32, i32) {
    %c0_i32 = arith.constant 0 : i32
    %c0_i32_0 = arith.constant 0 : i32
    %c0_i32_1 = arith.constant 0 : i32
    return %arg0, %c0_i32, %c0_i32_0 : i32, i32, i32
  }
}

</mosaic_0001>

<bundles_post_ra>
// kernel: tpu_custom_call.1
= control target key start
LH: loop header
LB: loop body
LE: loop exit
PB: predicated region body
PF: predicated region fallthrough
CT: control target
= control target key end

     0   :  { %10 = vsyncpa [#allocation4], 0  ;;  %vm20_vm0 = vcmask 261120   ;;  %s1333_s0 = inlined_call_operand.vmem [shape: f32[8,32], index: 0, kind: input, shape index: {}]   ;;  %s1334_s1 = inlined_call_operand.vmem [shape: s32[1,8], index: 1, kind: input, shape index: {}]   ;;  %s1335_s2 = inlined_call_operand.vmem [shape: s32[8,1], index: 2, kind: input, shape index: {}]   ;;  %s1336_s3 = inlined_call_operand.hbm [shape: f32[1,1,1], index: 3, kind: output, shape index: {0}]   ;;  %s1337_s4 = inlined_call_operand.hbm [shape: f32[1,1,1], index: 4, kind: output, shape index: {1}]  }
   0x1   :  { %v18_v0 = vld [vmem:[%s1333_s0] sm:$0xff] }
   0x2   :  { %11 = vsyncpa [#allocation6], 0  ;;  %v19_v1 = vmul.f32 %v18_v0, %v18_v0  ;;  %v1208_v3 = vmov 0.0   ;;  %vm1209_vm1 = vmmov 0   ;;  %v117_v4 = vld [vmem:[%s1335_s2] sm:$0xff]  ;;  %v1210_v5 = vmov 0  }
   0x3   :  { %1103 = vmatprep.subr.mxu0 %v1208_v3  ;;  %1108 = vmatprep.subr.mxu1 %v1208_v3  ;;  %v126_v9 = vlaneseq  ;;  %v1211_v12 = vmov 1.0   ;;  %v1052_v22 = vld [vmem:[%s1334_s1] ss:$0 sm:$0xff]  ;;  %vm135_vm9 = vcmask 64512   ;;  %s1212_s1 = smov [#allocation3]   ;;  %s1213_s21 = smov [#allocation5]  }
   0x4   :  { %v21_v2 = vsel %vm20_vm0, %v19_v1, 0.0  ;;  %1105 = vmatprep.mubr.msk.f32.mxu0 %vm1209_vm1, %v1208_v3  ;;  %1110 = vmatprep.mubr.msk.f32.mxu1 %vm1209_vm1, %v1208_v3  ;;  %s1020_s19 = sshll.u32 %s1212_s1, 4  ;;  %s1030_s22 = sshll.u32 %s1213_s21, 4  ;;  %s1021_s19 = int_to_ptr.vmem [resolvable:$true] %s1020_s19  ;;  %s1031_s22 = int_to_ptr.vmem [resolvable:$true] %s1030_s22 }
   0x5   :  { %22 = vadd.xlane.f32.xlu0 %v21_v2  ;;  %1159 = vset.pattern.permute.xlu1 %v1210_v5  ;;  %v1257_v10 = vshrl.u32 %v126_v9, 7  ;;  %v129_v11 = vand.u32 127, %v126_v9  ;;  %s1164_s24 = scalar_lea.vmem %s1021_s19, 16  ;;  %s1168_s25 = scalar_lea.vmem %s1021_s19, 32 }
   0x6   :  { %1158 = vset.pattern.permute.xlu0 %v1210_v5  ;;  %p1165_p0 = scmp.ne.s32.totalorder %s1021_s19, %s1164_s24  ;;  %p1169_p1 = scmp.lt.s32.totalorder %s1021_s19, %s1021_s19 }
   0x7   :  { %vm130_vm2 = vcmp.ne.s32.totalorder %v1257_v10, %v129_v11  ;;  %vm139_vm3 = vcmp.eq.s32.totalorder %v1257_v10, 0  ;;  %vm354_vm4 = vcmp.eq.s32.totalorder %v1257_v10, 2  ;;  %vm248_vm11 = vcmp.eq.s32.totalorder %v1257_v10, 1  ;;  %p1170_p2 = scmp.lt.s32.totalorder %s1168_s25, %s1164_s24 }
   0x8   :  { %1109 = vmatpush3.msk.msra.mxu1 %vm139_vm3, %v1211_v12  ;;  %vm566_vm12 = vcmp.eq.s32.totalorder %v1257_v10, 4  ;;  %vm460_vm13 = vcmp.eq.s32.totalorder %v1257_v10, 3  ;;  %vm778_vm14 = vcmp.eq.s32.totalorder %v1257_v10, 6  ;;  %vm672_vm15 = vcmp.eq.s32.totalorder %v1257_v10, 5 }
   0x9   :  { %1113 = vmatprep.subr.mxu1 %v1208_v3  ;;  %p1171_p3 = por %p1170_p2, %p1169_p1 }
   0xb   :  { %p1172_p4 = pnand %p1171_p3, %p1165_p0 }
  0x1b   :  { %119 = vperm.xlu0 %1158, %v117_v4  }
  0x8e   :  { %v23_v6 = vpop.xlane.xlu0 %22 }
  0x8f   :  { %1160 = vrsqrt.f32 %v23_v6 }
  0x96   :  { %v120_v23 = vpop.permute.xlu0 %119 }
  0x97   :  { %vm125_vm8 = vcmp.eq.s32.totalorder %v120_v23, %v1052_v22 }
  0x98   :  { %vm131_vm10 = vmand %vm125_vm8, %vm130_vm2 }
  0x9c   :  { %v1161_v7 = vpop.eup %1160 }
  0x9d   :  { %v25_v8 = vmul.f32 %v1161_v7, %v18_v0 }
  0x9f   :  { %1104 = vmatpush3.xpose.msk.msra.mxu0 %vm20_vm0, %v25_v8 }
  0xa0   :  { %1118 = vmatprep.subr.mxu0 %v1208_v3 }
  0xa2   :  { %1106 = vmatmul.mubr.msk.f32.vlgmr.msra.gmra.mxu0 %vm20_vm0, %v25_v8  ;;  %vm884_vm0 = vcmp.eq.s32.totalorder %v1257_v10, 7 }
  0xa3   :  { %1120 = vmatprep.mubr.msk.f32.mxu0 %vm1209_vm1, %v1208_v3  ;;  %1119 = vmatpush3.msk.msra.mxu0 %vm354_vm4, %v1211_v12 }
  0xa4   :  { %1128 = vmatprep.subr.mxu0 %v1208_v3 }
 0x162   :  { %v95_v13 = vpop.f32.mrf.mxu0 }
 0x163   :  { %v99_v14 = vmul.f32 2.0, %v95_v13 }
 0x164   :  { %v1107_v15 = vpop.f32.mrf.mxu0 }
 0x165   :  { %v100_v16 = vsub.f32 2.0, %v99_v14 }
 0x167   :  { %v101_v17 = vmax.f32 %v100_v16, 0.0 }
 0x169   :  { %vm102_vm5 = vcmp.eq.f32.partialorder %v101_v17, 0.0 }
 0x16a   :  { %v1051_v18 = vsel %vm102_vm5, 1.0, %v1208_v3 }
 0x16b   :  { %v106_v19 = vmul.f32 1e-16, %v1051_v18  ;;  %v105_v26 = vsub.f32 1.0, %v1051_v18 }
 0x16d   :  { %v107_v20 = vadd.f32 %v106_v19, %v101_v17 }
 0x16f   :  { %1162 = vrsqrt.f32 %v107_v20  ;;  %vm110_vm6 = vcmp.eq.f32.partialorder %v107_v20, inf  ;;  %v113_v25 = vand.u32 2147483648, %v107_v20  ;;  %vm112_vm7 = vcmp.eq.f32.partialorder %v107_v20, 0.0 }
 0x17c   :  { %v1163_v21 = vpop.eup %1162 }
 0x17d   :  { %v109_v24 = vmul.f32 %v1163_v21, %v107_v20 }
 0x17f   :  { %v111_v27 = vsel %vm110_vm6, %v107_v20, %v109_v24 }
 0x180   :  { %v114_v28 = vsel %vm112_vm7, %v113_v25, %v111_v27 }
 0x181   :  { %v115_v29 = vmul.f32 %v114_v28, %v105_v26 }
 0x183   :  { %v132_v30 = vadd.f32 0.9, %v115_v29  ;;  %v134_v31 = vsel %vm125_vm8, 1e+09, %v115_v29 }
 0x184   :  { %136 = vst.msk [vmem:[#allocation2] sm:$0xff] %vm135_vm9, %v134_v31 }
 0x185   :  { %v133_v32 = vsel %vm131_vm10, %v132_v30, -1e+09  ;;  %vm1000_vm10 = vcmask 0  }
 0x186   :  { %1111 = vmatmul.mubr.msk.f32.vlgmr.msra.gmra.mxu1 %vm135_vm9, %v133_v32  ;;  %1121 = vmatmul.mubr.msk.f32.vlgmr.msra.gmra.mxu0 %vm135_vm9, %v133_v32 }
 0x187   :  { %1114 = vmatpush3.msk.msra.mxu1 %vm248_vm11, %v1211_v12  ;;  %1115 = vmatprep.mubr.msk.f32.mxu1 %vm1209_vm1, %v1208_v3 }
 0x188   :  { %1129 = vmatpush3.msk.msra.mxu0 %vm566_vm12, %v1211_v12  ;;  %1130 = vmatprep.mubr.msk.f32.mxu0 %vm1209_vm1, %v1208_v3 }
 0x189   :  { %1123 = vmatprep.subr.mxu1 %v1208_v3  ;;  %1138 = vmatprep.subr.mxu0 %v1208_v3 }
 0x18a   :  { %1116 = vmatmul.mubr.msk.f32.vlgmr.msra.gmra.mxu1 %vm135_vm9, %v133_v32  ;;  %1131 = vmatmul.mubr.msk.f32.vlgmr.msra.gmra.mxu0 %vm135_vm9, %v133_v32 }
 0x18b   :  { %1124 = vmatpush3.msk.msra.mxu1 %vm460_vm13, %v1211_v12  ;;  %1125 = vmatprep.mubr.msk.f32.mxu1 %vm1209_vm1, %v1208_v3  ;;  %v1056_v49 = vld [vmem:[#allocation2] ss:$0 sm:$0xff]  ;;  %v1064_v53 = vld [vmem:[#allocation2 + $0x2] ss:$0 sm:$0xff]  ;;  %v1060_v61 = vld [vmem:[#allocation2 + $0x1] ss:$0 sm:$0xff] }
 0x18c   :  { %1139 = vmatpush3.msk.msra.mxu0 %vm778_vm14, %v1211_v12  ;;  %1140 = vmatprep.mubr.msk.f32.mxu0 %vm1209_vm1, %v1208_v3  ;;  %v1072_v7 = vld [vmem:[#allocation2 + $0x4] ss:$0 sm:$0xff]  ;;  %v1068_v26 = vld [vmem:[#allocation2 + $0x3] ss:$0 sm:$0xff] }
 0x18d   :  { %1133 = vmatprep.subr.mxu1 %v1208_v3 }
 0x18e   :  { %1126 = vmatmul.mubr.msk.f32.vlgmr.msra.gmra.mxu1 %vm135_vm9, %v133_v32  ;;  %1141 = vmatmul.mubr.msk.f32.vlgmr.msra.gmra.mxu0 %vm135_vm9, %v133_v32 }
 0x18f   :  { %1134 = vmatpush3.msk.msra.mxu1 %vm672_vm15, %v1211_v12  ;;  %1135 = vmatprep.mubr.msk.f32.mxu1 %vm1209_vm1, %v1208_v3 }
 0x190   :  { %1143 = vmatprep.subr.mxu1 %v1208_v3 }
 0x192   :  { %1136 = vmatmul.mubr.msk.f32.vlgmr.msra.gmra.mxu1 %vm135_vm9, %v133_v32 }
 0x193   :  { %1144 = vmatpush3.msk.msra.mxu1 %vm884_vm0, %v1211_v12  ;;  %1145 = vmatprep.mubr.msk.f32.mxu1 %vm1209_vm1, %v1208_v3 }
 0x196   :  { %1146 = vmatmul.mubr.msk.f32.vlgmr.msra.gmra.mxu1 %vm135_vm9, %v133_v32 }
 0x246   :  { %v211_v33 = vpop.f32.mrf.mxu1  ;;  %v423_v34 = vpop.f32.mrf.mxu0 }
 0x247   :  { %219 = vperm.xlu1 %1159, %v211_v33  }
 0x248   :  { %v1112_v35 = vpop.f32.mrf.mxu1  ;;  %v1122_v36 = vpop.f32.mrf.mxu0 }
 0x24a   :  { %v317_v37 = vpop.f32.mrf.mxu1  ;;  %v635_v38 = vpop.f32.mrf.mxu0 }
 0x24b   :  { %431 = vperm.xlu1 %1159, %v423_v34  }
 0x24c   :  { %v1117_v39 = vpop.f32.mrf.mxu1  ;;  %v1132_v40 = vpop.f32.mrf.mxu0 }
 0x24d   :  { %v1080_v39 = vld [vmem:[#allocation2 + $0x6] ss:$0 sm:$0xff] }
 0x24e   :  { %v529_v41 = vpop.f32.mrf.mxu1  ;;  %v847_v42 = vpop.f32.mrf.mxu0 }
 0x24f   :  { %325 = vperm.xlu1 %1159, %v317_v37  }
 0x250   :  { %v1127_v43 = vpop.f32.mrf.mxu1  ;;  %v1142_v44 = vpop.f32.mrf.mxu0 }
 0x252   :  { %v741_v45 = vpop.f32.mrf.mxu1 }
 0x253   :  { %643 = vperm.xlu1 %1159, %v635_v38  }
 0x254   :  { %v1137_v46 = vpop.f32.mrf.mxu1 }
 0x256   :  { %v953_v47 = vpop.f32.mrf.mxu1 }
 0x257   :  { %537 = vperm.xlu1 %1159, %v529_v41  }
 0x258   :  { %v1147_v48 = vpop.f32.mrf.mxu1 }
 0x25b   :  { %855 = vperm.xlu1 %1159, %v847_v42  }
 0x25f   :  { %749 = vperm.xlu1 %1159, %v741_v45  }
 0x263   :  { %961 = vperm.xlu1 %1159, %v953_v47  }
 0x2c2   :  { %v220_v50 = vpop.permute.xlu1 %219 }
 0x2c3   :  { %v226_v51 = vsub.f32 %v220_v50, %v1056_v49 }
 0x2c5   :  { %v227_v52 = vmax.f32 %v226_v51, 0.0 }
 0x2c6   :  { %v432_v54 = vpop.permute.xlu1 %431 }
 0x2c7   :  { %v228_v55 = vsel %vm135_vm9, %v227_v52, 0.0  ;;  %vm236_vm1 = vcmp.gt.f32.partialorder %v227_v52, 1e-16  ;;  %v438_v56 = vsub.f32 %v432_v54, %v1064_v53 }
 0x2c8   :  { %v229_v57 = vrot.slane %v228_v55, 4  ;;  %v237_v58 = vsel %vm236_vm1, 1.0, %v1208_v3 }
 0x2c9   :  { %v238_v59 = vsel %vm135_vm9, %v237_v58, 0.0  ;;  %v439_v60 = vmax.f32 %v438_v56, 0.0 }
 0x2ca   :  { %v326_v62 = vpop.permute.xlu1 %325  ;;  %v230_v1 = vadd.f32 %v229_v57, %v228_v55  ;;  %v239_v2 = vrot.slane %v238_v59, 4 }
 0x2cb   :  { %v440_v63 = vsel %vm135_vm9, %v439_v60, 0.0  ;;  %vm448_vm2 = vcmp.gt.f32.partialorder %v439_v60, 1e-16  ;;  %v332_v0 = vsub.f32 %v326_v62, %v1060_v61 }
 0x2cc   :  { %v449_v4 = vsel %vm448_vm2, 1.0, %v1208_v3  ;;  %v441_v6 = vrot.slane %v440_v63, 4  ;;  %v231_v12 = vrot.slane %v230_v1, 2  ;;  %v240_v13 = vadd.f32 %v239_v2, %v238_v59 }
 0x2cd   :  { %v333_v5 = vmax.f32 %v332_v0, 0.0  ;;  %v450_v9 = vsel %vm135_vm9, %v449_v4, 0.0 }
 0x2ce   :  { %v644_v8 = vpop.permute.xlu1 %643  ;;  %v442_v17 = vadd.f32 %v441_v6, %v440_v63  ;;  %v451_v18 = vrot.slane %v450_v9, 4  ;;  %v232_v23 = vadd.f32 %v231_v12, %v230_v1  ;;  %v241_v24 = vrot.slane %v240_v13, 2 }
 0x2cf   :  { %v334_v10 = vsel %vm135_vm9, %v333_v5, 0.0  ;;  %vm342_vm3 = vcmp.gt.f32.partialorder %v333_v5, 1e-16  ;;  %v650_v11 = vsub.f32 %v644_v8, %v1072_v7 }
 0x2d0   :  { %v335_v14 = vrot.slane %v334_v10, 4  ;;  %v343_v15 = vsel %vm342_vm3, 1.0, %v1208_v3  ;;  %v443_v31 = vrot.slane %v442_v17, 2  ;;  %v452_v35 = vadd.f32 %v451_v18, %v450_v9 }
 0x2d1   :  { %v651_v16 = vmax.f32 %v650_v11, 0.0  ;;  %v344_v21 = vsel %vm135_vm9, %v343_v15, 0.0  ;;  %v233_v42 = vrot.slane %v232_v23, 1  ;;  %v242_v43 = vadd.f32 %v241_v24, %v240_v13  ;;  %v1084_v15 = vld [vmem:[#allocation2 + $0x7] ss:$0 sm:$0xff] }
 0x2d2   :  { %v538_v19 = vpop.permute.xlu1 %537  ;;  %v336_v20 = vadd.f32 %v335_v14, %v334_v10  ;;  %v345_v25 = vrot.slane %v344_v21, 4  ;;  %v444_v50 = vadd.f32 %v443_v31, %v442_v17  ;;  %v453_v51 = vrot.slane %v452_v35, 2  ;;  %v1076_v10 = vld [vmem:[#allocation2 + $0x5] ss:$0 sm:$0xff] }
 0x2d3   :  { %v652_v22 = vsel %vm135_vm9, %v651_v16, 0.0  ;;  %vm660_vm4 = vcmp.gt.f32.partialorder %v651_v16, 1e-16  ;;  %v544_v30 = vsub.f32 %v538_v19, %v1068_v26  ;;  %v234_v58 = vadd.f32 %v233_v42, %v232_v23 }
 0x2d4   :  { %v337_v27 = vrot.slane %v336_v20, 2  ;;  %v653_v28 = vrot.slane %v652_v22, 4  ;;  %v661_v29 = vsel %vm660_vm4, 1.0, %v1208_v3  ;;  %v346_v32 = vadd.f32 %v345_v25, %v344_v21 }
 0x2d5   :  { %v662_v33 = vsel %vm135_vm9, %v661_v29, 0.0  ;;  %v545_v38 = vmax.f32 %v544_v30, 0.0  ;;  %v243_v0 = vrot.slane %v242_v43, 1  ;;  %v445_v1 = vrot.slane %v444_v50, 1 }
 0x2d6   :  { %v856_v34 = vpop.permute.xlu1 %855  ;;  %v338_v36 = vadd.f32 %v337_v27, %v336_v20  ;;  %v654_v37 = vadd.f32 %v653_v28, %v652_v22  ;;  %v663_v40 = vrot.slane %v662_v33, 4  ;;  %v347_v44 = vrot.slane %v346_v32, 2 }
 0x2d7   :  { %v862_v41 = vsub.f32 %v856_v34, %v1080_v39  ;;  %v546_v45 = vsel %vm135_vm9, %v545_v38, 0.0  ;;  %vm554_vm5 = vcmp.gt.f32.partialorder %v545_v38, 1e-16  ;;  %v454_v2 = vadd.f32 %v453_v51, %v452_v35 }
 0x2d8   :  { %v339_v46 = vrot.slane %v338_v36, 1  ;;  %v547_v47 = vrot.slane %v546_v45, 4  ;;  %v655_v52 = vrot.slane %v654_v37, 2  ;;  %v555_v53 = vsel %vm554_vm5, 1.0, %v1208_v3 }
 0x2d9   :  { %v863_v48 = vmax.f32 %v862_v41, 0.0  ;;  %v664_v54 = vadd.f32 %v663_v40, %v662_v33  ;;  %v556_v56 = vsel %vm135_vm9, %v555_v53, 0.0  ;;  %v348_v59 = vadd.f32 %v347_v44, %v346_v32 }
 0x2da   :  { %v750_v49 = vpop.permute.xlu1 %749  ;;  %v548_v55 = vadd.f32 %v547_v47, %v546_v45  ;;  %v557_v60 = vrot.slane %v556_v56, 4  ;;  %v340_v61 = vadd.f32 %v339_v46, %v338_v36  ;;  %v656_v6 = vadd.f32 %v655_v52, %v654_v37 }
 0x2db   :  { %v864_v57 = vsel %vm135_vm9, %v863_v48, 0.0  ;;  %vm872_vm6 = vcmp.gt.f32.partialorder %v863_v48, 1e-16  ;;  %v665_v7 = vrot.slane %v664_v54, 2  ;;  %v349_v11 = vrot.slane %v348_v59, 1 }
 0x2dc   :  { %v549_v62 = vrot.slane %v548_v55, 2  ;;  %v865_v63 = vrot.slane %v864_v57, 4  ;;  %v558_v4 = vadd.f32 %v557_v60, %v556_v56  ;;  %v873_v9 = vsel %vm872_vm6, 1.0, %v1208_v3 }
 0x2dd   :  { %v874_v13 = vsel %vm135_vm9, %v873_v9, 0.0  ;;  %v756_v14 = vsub.f32 %v750_v49, %v1076_v10  ;;  %v341_v16 = vadd.f32 %v340_v61, %v234_v58  ;;  %v244_v20 = vadd.f32 %v243_v0, %v242_v43 }
 0x2de   :  { %v962_v5 = vpop.permute.xlu1 %961  ;;  %v550_v8 = vadd.f32 %v549_v62, %v548_v55  ;;  %v559_v12 = vrot.slane %v558_v4, 2  ;;  %v866_v17 = vadd.f32 %v865_v63, %v864_v57  ;;  %v875_v18 = vrot.slane %v874_v13, 4 }
 0x2df   :  { %v968_v19 = vsub.f32 %v962_v5, %v1084_v15  ;;  %v446_v21 = vadd.f32 %v445_v1, %v444_v50  ;;  %v757_v23 = vmax.f32 %v756_v14, 0.0  ;;  %v455_v24 = vrot.slane %v454_v2, 1 }
 0x2e0   :  { %v560_v22 = vadd.f32 %v559_v12, %v558_v4  ;;  %v657_v25 = vrot.slane %v656_v6, 1  ;;  %v551_v26 = vrot.slane %v550_v8, 1  ;;  %v350_v28 = vadd.f32 %v349_v11, %v348_v59 }
 0x2e1   :  { %v969_v27 = vmax.f32 %v968_v19, 0.0  ;;  %v876_v29 = vadd.f32 %v875_v18, %v874_v13  ;;  %v758_v30 = vsel %vm135_vm9, %v757_v23, 0.0  ;;  %vm766_vm7 = vcmp.gt.f32.partialorder %v757_v23, 1e-16 }
 0x2e2   :  { %v666_v31 = vadd.f32 %v665_v7, %v664_v54  ;;  %v447_v32 = vadd.f32 %v446_v21, %v341_v16  ;;  %v867_v33 = vrot.slane %v866_v17, 2  ;;  %v759_v34 = vrot.slane %v758_v30, 4 }
 0x2e3   :  { %v561_v35 = vrot.slane %v560_v22, 1  ;;  %v767_v36 = vsel %vm766_vm7, 1.0, %v1208_v3  ;;  %v970_v37 = vsel %vm135_vm9, %v969_v27, 0.0  ;;  %vm978_vm8 = vcmp.gt.f32.partialorder %v969_v27, 1e-16 }
 0x2e4   :  { %v552_v38 = vadd.f32 %v551_v26, %v550_v8  ;;  %v760_v39 = vadd.f32 %v759_v34, %v758_v30  ;;  %v768_v40 = vsel %vm135_vm9, %v767_v36, 0.0  ;;  %v971_v41 = vrot.slane %v970_v37, 4 }
 0x2e5   :  { %v351_v42 = vadd.f32 %v350_v28, %v244_v20  ;;  %v877_v43 = vrot.slane %v876_v29, 2  ;;  %v769_v44 = vrot.slane %v768_v40, 4  ;;  %v979_v45 = vsel %vm978_vm8, 1.0, %v1208_v3 }
 0x2e6   :  { %v868_v46 = vadd.f32 %v867_v33, %v866_v17  ;;  %v761_v47 = vrot.slane %v760_v39, 2  ;;  %v972_v48 = vadd.f32 %v971_v41, %v970_v37  ;;  %v980_v49 = vsel %vm135_vm9, %v979_v45, 0.0 }
 0x2e7   :  { %v456_v50 = vadd.f32 %v455_v24, %v454_v2  ;;  %v562_v51 = vadd.f32 %v561_v35, %v560_v22  ;;  %v770_v52 = vadd.f32 %v769_v44, %v768_v40  ;;  %v981_v53 = vrot.slane %v980_v49, 4 }
 0x2e8   :  { %v667_v54 = vrot.slane %v666_v31, 1  ;;  %v553_v55 = vadd.f32 %v552_v38, %v447_v32  ;;  %v762_v56 = vadd.f32 %v761_v47, %v760_v39  ;;  %v973_v57 = vrot.slane %v972_v48, 2 }
 0x2e9   :  { %v878_v58 = vadd.f32 %v877_v43, %v876_v29  ;;  %v771_v59 = vrot.slane %v770_v52, 2  ;;  %v982_v60 = vadd.f32 %v981_v53, %v980_v49  ;;  %v457_v61 = vadd.f32 %v456_v50, %v351_v42 }
 0x2ea   :  { %v658_v62 = vadd.f32 %v657_v25, %v656_v6  ;;  %v869_v63 = vrot.slane %v868_v46, 1  ;;  %v763_v3 = vrot.slane %v762_v56, 1  ;;  %v974_v0 = vadd.f32 %v973_v57, %v972_v48 }
 0x2eb   :  { %v772_v1 = vadd.f32 %v771_v59, %v770_v52  ;;  %v983_v4 = vrot.slane %v982_v60, 2  ;;  %v563_v5 = vadd.f32 %v562_v51, %v457_v61  ;;  %v668_v9 = vadd.f32 %v667_v54, %v666_v31 }
 0x2ec   :  { %v764_v7 = vadd.f32 %v763_v3, %v762_v56  ;;  %v659_v2 = vadd.f32 %v658_v62, %v553_v55  ;;  %v975_v8 = vrot.slane %v974_v0, 1  ;;  %v879_v11 = vrot.slane %v878_v58, 1 }
 0x2ed   :  { %v773_v10 = vrot.slane %v772_v1, 1  ;;  %v984_v12 = vadd.f32 %v983_v4, %v982_v60  ;;  %v870_v14 = vadd.f32 %v869_v63, %v868_v46  ;;  %v669_v16 = vadd.f32 %v668_v9, %v563_v5 }
 0x2ee   :  { %v765_v13 = vadd.f32 %v764_v7, %v659_v2  ;;  %v976_v15 = vadd.f32 %v975_v8, %v974_v0  ;;  %vm988_vm9 = vcmask 57344   ;;  %v880_v20 = vadd.f32 %v879_v11, %v878_v58 }
 0x2ef   :  { %v774_v17 = vadd.f32 %v773_v10, %v772_v1  ;;  %v985_v18 = vrot.slane %v984_v12, 1 }
 0x2f0   :  { %v871_v6 = vadd.f32 %v870_v14, %v765_v13 }
 0x2f1   :  { %v775_v19 = vadd.f32 %v774_v17, %v669_v16  ;;  %v986_v21 = vadd.f32 %v985_v18, %v984_v12 }
 0x2f2   :  { %v977_v22 = vadd.f32 %v976_v15, %v871_v6 }
 0x2f3   :  { %v881_v23 = vadd.f32 %v880_v20, %v775_v19 }
 0x2f4   :  { %v989_v24 = vsel %vm988_vm9, %v977_v22, 0.0 }
 0x2f5   :  { %990 = vadd.xlane.f32.xlu1 %v989_v24  ;;  %v987_v25 = vadd.f32 %v986_v21, %v881_v23 }
 0x2f7   :  { %v1002_v26 = vsel %vm988_vm9, %v987_v25, 0.0 }
 0x2f8   :  { %1003 = vadd.xlane.f32.xlu0 %v1002_v26 }
 0x37e   :  { %v991_v27 = vpop.xlane.xlu1 %990 }
 0x37f   :  { %v992_v28 = vrot.slane %v991_v27, 4 }
 0x381   :  { %v993_v29 = vadd.f32 %v992_v28, %v991_v27  ;;  %v1004_v30 = vpop.xlane.xlu0 %1003 }
 0x382   :  { %v1005_v31 = vrot.slane %v1004_v30, 4 }
 0x383   :  { %v994_v32 = vrot.slane %v993_v29, 2 }
 0x384   :  { %v1006_v33 = vadd.f32 %v1005_v31, %v1004_v30 }
 0x385   :  { %v995_v34 = vadd.f32 %v994_v32, %v993_v29 }
 0x386   :  { %v1007_v35 = vrot.slane %v1006_v33, 2 }
 0x387   :  { %v996_v36 = vrot.slane %v995_v34, 1 }
 0x388   :  { %v1008_v37 = vadd.f32 %v1007_v35, %v1006_v33 }
 0x389   :  { %v997_v38 = vadd.f32 %v996_v36, %v995_v34 }
 0x38a   :  { %v1009_v39 = vrot.slane %v1008_v37, 1 }
 0x38b   :  { %1148 = vpush %v997_v38 }
 0x38c   :  { %v1010_v40 = vadd.f32 %v1009_v39, %v1008_v37 }
 0x38e   :  { %1150 = vpush %v1010_v40 }
 0x3bc   :  { %s1149_s20 = spop %1148 }
 0x3bd   :  { %v999_v41 = vstv %s1149_s20 }
 0x3be   :  { %1001 = vst.msk [vmem:[#allocation3] sm:$0x1] %vm1000_vm10, %v999_v41 }
 0x3bf   :  { %s1151_s23 = spop %1150 }
 0x3c0   :  { %v1012_v42 = vstv %s1151_s23 }
 0x3c1   :  { %1175 = shalt.err (!%p1172_p4)
}
 0x3c2   :  { %1023 = dma.vmem_to_hbm [thread:$0]  %s1021_s19, 16, %s1336_s3, [#allocation4]   ;;  %1013 = vst.msk [vmem:[#allocation5] sm:$0x1] %vm1000_vm10, %v1012_v42 }
 0x3c3   :  { %s1184_s28 = scalar_lea.vmem %s1031_s22, 16  ;;  %s1188_s29 = scalar_lea.vmem %s1031_s22, 32 }
 0x3c4   :  { %p1185_p5 = scmp.ne.s32.totalorder %s1031_s22, %s1184_s28  ;;  %p1189_p6 = scmp.lt.s32.totalorder %s1031_s22, %s1031_s22 }
 0x3c5   :  { %p1190_p7 = scmp.lt.s32.totalorder %s1188_s29, %s1184_s28 }
 0x3c7   :  { %p1191_p8 = por %p1190_p7, %p1189_p6 }
 0x3c9   :  { %p1192_p9 = pnand %p1191_p8, %p1185_p5 }
 0x3cb   :  { %1195 = shalt.err (!%p1192_p9)
}
 0x3cc   :  { %1033 = dma.vmem_to_hbm [thread:$0]  %s1031_s22, 16, %s1337_s4, [#allocation6]  }
 0x3cd   :  { %1204 = dma.done.wait [#allocation4], 16  }
 0x3ce   :  { %1205 = vsyncadd [#allocation4], 4294967280 }
 0x3cf   :  { %1206 = dma.done.wait [#allocation6], 16  }
 0x3d0   :  { %1207 = vsyncadd [#allocation6], 4294967280 }
 0x3d1   :  { %1040 = vsyncpa [#allocation4], 1 }
 0x3d2   :  { %1041 = vsyncpa [#allocation6], 1 }

</bundles_post_ra>
